<compile_context>
chip_gen: v7x
topology: tpu7x:2x2x1
jax: 0.10.0
libtpu: 0.0.40
codegen_flags: <defaults>
</compile_context>

<pallas_src>
import jax
import jax.numpy as jnp
from jax.experimental import pallas as pl
from jax.experimental.pallas import tpu as pltpu

EPS = 1e-5

_DEF_ROW_BLOCK = 256          # target sublane tile (rounded to dtype sublane multiple)
_DEF_LANE_BLOCK = 2048        # target lane tile (rounded to multiple of 128)
_LANE_DENSE_THRESHOLD = 128   # below this H*W, switch to the (N, C*H*W) lane-dense layout


def _affine_kernel(scale_ref, shift_ref, x_ref, o_ref):
    # scale/shift broadcast against x: (rb, 1) in the row-major layout,
    # (1, lb) in the lane-dense layout.  f32 math, I/O dtype preserved.
    x = x_ref[...].astype(jnp.float32)
    o_ref[...] = (x * scale_ref[...] + shift_ref[...]).astype(o_ref.dtype)


def _sublane_multiple(dtype):
    # 8 for 4-byte dtypes, 16 for 2-byte, 32 for 1-byte.
    itemsize = jnp.dtype(dtype).itemsize
    return 8 * (4 // itemsize)


def _round_up(v, m):
    return ((v + m - 1) // m) * m


def _pick_block(extent, target, multiple):
    target = max(_round_up(target, multiple), multiple)
    if extent <= target:
        return extent          # full-dim block is always legal
    return target


def frozen_batch_norm_2d(x, weight, bias, running_mean, running_var,
                         *, row_block=_DEF_ROW_BLOCK,
                         lane_block=_DEF_LANE_BLOCK):
    """x: (N, C, H, W) float32/bfloat16; per-channel params: (C,)."""
    N, C, H, W = x.shape
    L = H * W

    # Precompute per-channel scale/shift in f32 (tiny XLA op).
    w = weight.astype(jnp.float32)
    b = bias.astype(jnp.float32)
    rm = running_mean.astype(jnp.float32)
    rv = running_var.astype(jnp.float32)
    scale = w * jax.lax.rsqrt(rv + EPS)
    shift = b - rm * scale

    sub = _sublane_multiple(x.dtype)
    lane_block = max(_round_up(lane_block, 128), 128)
    itemsize = jnp.dtype(x.dtype).itemsize
    total = N * C * L
    cost = pl.CostEstimate(flops=2 * total, transcendentals=0,
                           bytes_accessed=2 * total * itemsize)
    cparams = pltpu.CompilerParams(dimension_semantics=("parallel", "parallel"))

    if L >= _LANE_DENSE_THRESHOLD:
        # --- Layout A: rows = N*C on sublanes, H*W on lanes (free contiguous view) ---
        R = N * C
        x2 = x.reshape(R, L)
        scale2 = jnp.broadcast_to(scale[None, :], (N, C)).reshape(R, 1)
        shift2 = jnp.broadcast_to(shift[None, :], (N, C)).reshape(R, 1)
        rb = _pick_block(R, row_block, sub)
        lb = L if L <= lane_block else lane_block
        grid = (pl.cdiv(R, rb), pl.cdiv(L, lb))  # row axis outermost: params stay resident
        out2 = pl.pallas_call(
            _affine_kernel,
            out_shape=jax.ShapeDtypeStruct((R, L), x.dtype),
            grid=grid,
            in_specs=[
                pl.BlockSpec((rb, 1), lambda r, l: (r, 0)),
                pl.BlockSpec((rb, 1), lambda r, l: (r, 0)),
                pl.BlockSpec((rb, lb), lambda r, l: (r, l)),
            ],
            out_specs=pl.BlockSpec((rb, lb), lambda r, l: (r, l)),
            compiler_params=cparams,
            cost_estimate=cost,
        )(scale2, shift2, x2)
        return out2.reshape(N, C, H, W)

    # --- Layout B: lane-dense fallback for small spatial (e.g. 7x7) ---
    # rows = N on sublanes, C*H*W on lanes; scale/shift expanded to lane vectors
    # (C*L*4 bytes each, trivial).  Channel/lane grid axis is outermost so the
    # vectors stay VMEM-resident across batch-row steps.
    CL = C * L
    x2 = x.reshape(N, CL)
    scale_v = jnp.repeat(scale, L).reshape(1, CL)
    shift_v = jnp.repeat(shift, L).reshape(1, CL)
    rb = _pick_block(N, row_block, sub)
    lb = CL if CL <= lane_block else lane_block
    grid = (pl.cdiv(CL, lb), pl.cdiv(N, rb))
    out2 = pl.pallas_call(
        _affine_kernel,
        out_shape=jax.ShapeDtypeStruct((N, CL), x.dtype),
        grid=grid,
        in_specs=[
            pl.BlockSpec((1, lb), lambda l, r: (0, l)),
            pl.BlockSpec((1, lb), lambda l, r: (0, l)),
            pl.BlockSpec((rb, lb), lambda l, r: (r, l)),
        ],
        out_specs=pl.BlockSpec((rb, lb), lambda l, r: (r, l)),
        compiler_params=cparams,
        cost_estimate=cost,
    )(scale_v, shift_v, x2)
    return out2.reshape(N, C, H, W)


def _reference(x, weight, bias, running_mean, running_var):
    w = weight.reshape(1, -1, 1, 1).astype(jnp.float32)
    b = bias.reshape(1, -1, 1, 1).astype(jnp.float32)
    rv = running_var.reshape(1, -1, 1, 1).astype(jnp.float32)
    rm = running_mean.reshape(1, -1, 1, 1).astype(jnp.float32)
    scale = w * jax.lax.rsqrt(rv + EPS)
    out = x.astype(jnp.float32) * scale + (b - rm * scale)
    return out.astype(x.dtype)


if __name__ == "__main__":
    key = jax.random.PRNGKey(0)
    kx, kw, kb, km, kv = jax.random.split(key, 5)

    # --- Test 1: small f32 NCHW input (module-consistent shapes), layout A ---
    N, C, H, W = 2, 4, 16, 16
    x = jax.random.normal(kx, (N, C, H, W), dtype=jnp.float32)
    weight = 1.0 + 0.1 * jax.random.normal(kw, (C,), dtype=jnp.float32)
    bias = 0.1 * jax.random.normal(kb, (C,), dtype=jnp.float32)
    running_mean = 0.5 * jax.random.normal(km, (C,), dtype=jnp.float32)
    running_var = jax.random.uniform(kv, (C,), dtype=jnp.float32,
                                     minval=0.5, maxval=1.5)

    out = frozen_batch_norm_2d(x, weight, bias, running_mean, running_var)
    out = jax.block_until_ready(out)
    ref = _reference(x, weight, bias, running_mean, running_var)
    assert out.shape == (N, C, H, W)
    assert jnp.allclose(out, ref, atol=1e-5, rtol=1e-5)

    # --- Test 2: multi-tile grid with partial row/lane blocks (layout A) ---
    N2, C2, H2, W2 = 2, 12, 20, 20          # R = 24 rows, L = 400 lanes
    x2 = jax.random.normal(kx, (N2, C2, H2, W2), dtype=jnp.float32)
    w2 = 1.0 + 0.1 * jax.random.normal(kw, (C2,), dtype=jnp.float32)
    b2 = 0.1 * jax.random.normal(kb, (C2,), dtype=jnp.float32)
    rm2 = 0.5 * jax.random.normal(km, (C2,), dtype=jnp.float32)
    rv2 = jax.random.uniform(kv, (C2,), dtype=jnp.float32,
                             minval=0.5, maxval=1.5)
    out2 = frozen_batch_norm_2d(x2, w2, b2, rm2, rv2,
                                row_block=8, lane_block=128)
    out2 = jax.block_until_ready(out2)
    ref2 = _reference(x2, w2, b2, rm2, rv2)
    assert jnp.allclose(out2, ref2, atol=1e-5, rtol=1e-5)

    # --- Test 3: bf16 I/O (row block auto-rounds to the bf16 sublane multiple) ---
    xb = x.astype(jnp.bfloat16)
    outb = frozen_batch_norm_2d(xb, weight, bias, running_mean, running_var,
                                row_block=8, lane_block=128)
    outb = jax.block_until_ready(outb)
    refb = _reference(xb, weight, bias, running_mean, running_var)
    assert outb.dtype == jnp.bfloat16
    assert jnp.allclose(outb.astype(jnp.float32), refb.astype(jnp.float32),
                        atol=2e-2, rtol=2e-2)

    # --- Test 4: small spatial extent (7x7) exercises the lane-dense layout B ---
    N4, C4, H4, W4 = 2, 8, 7, 7             # L = 49 < 128 -> layout B, CL = 392
    x4 = jax.random.normal(kx, (N4, C4, H4, W4), dtype=jnp.float32)
    w4 = 1.0 + 0.1 * jax.random.normal(kw, (C4,), dtype=jnp.float32)
    b4 = 0.1 * jax.random.normal(kb, (C4,), dtype=jnp.float32)
    rm4 = 0.5 * jax.random.normal(km, (C4,), dtype=jnp.float32)
    rv4 = jax.random.uniform(kv, (C4,), dtype=jnp.float32,
                             minval=0.5, maxval=1.5)
    out4 = frozen_batch_norm_2d(x4, w4, b4, rm4, rv4, lane_block=128)
    out4 = jax.block_until_ready(out4)
    ref4 = _reference(x4, w4, b4, rm4, rv4)
    assert jnp.allclose(out4, ref4, atol=1e-5, rtol=1e-5)

    print("KERNEL_OK")
</pallas_src>

<mosaic_0001>
module attributes {stable_mosaic.version = 11 : i64} {
  func.func @_affine_kernel(%arg0: i32, %arg1: i32, %arg2: memref<8x1xf32, #tpu.memory_space<vmem>>, %arg3: memref<8x1xf32, #tpu.memory_space<vmem>>, %arg4: memref<8x256xf32, #tpu.memory_space<vmem>>, %arg5: memref<8x256xf32, #tpu.memory_space<vmem>>) attributes {dimension_semantics = [#tpu.dimension_semantics<parallel>, #tpu.dimension_semantics<parallel>], iteration_bounds = array<i64: 1, 1>, scalar_prefetch = 0 : i64, scratch_operands = 0 : i64, tpu.core_type = #tpu.core_type<tc>, window_params = [{transform_indices = @transform_0, window_bounds = array<i64: 8, 1>}, {transform_indices = @transform_1, window_bounds = array<i64: 8, 1>}, {transform_indices = @transform_2, window_bounds = array<i64: 8, 256>}, {transform_indices = @transform_3, window_bounds = array<i64: 8, 256>}]} {
    %c0 = arith.constant 0 : index
    %c0_0 = arith.constant 0 : index
    %0 = vector.load %arg4[%c0, %c0_0] : memref<8x256xf32, #tpu.memory_space<vmem>>, vector<8x256xf32>
    %c0_1 = arith.constant 0 : index
    %c0_2 = arith.constant 0 : index
    %1 = vector.load %arg2[%c0_1, %c0_2] : memref<8x1xf32, #tpu.memory_space<vmem>>, vector<8x1xf32>
    %2 = vector.broadcast %1 : vector<8x1xf32> to vector<8x256xf32>
    %3 = arith.mulf %0, %2 : vector<8x256xf32>
    %c0_3 = arith.constant 0 : index
    %c0_4 = arith.constant 0 : index
    %4 = vector.load %arg3[%c0_3, %c0_4] : memref<8x1xf32, #tpu.memory_space<vmem>>, vector<8x1xf32>
    %5 = vector.broadcast %4 : vector<8x1xf32> to vector<8x256xf32>
    %6 = arith.addf %3, %5 : vector<8x256xf32>
    %c0_5 = arith.constant 0 : index
    %c0_6 = arith.constant 0 : index
    %7 = vector.load %arg5[%c0_5, %c0_6] : memref<8x256xf32, #tpu.memory_space<vmem>>, vector<8x256xf32>
    tpu.vector_store %arg5[%c0_5, %c0_6], %6 {strides = array<i32>} : memref<8x256xf32, #tpu.memory_space<vmem>>, vector<8x256xf32>,
    return
  }
  func.func @transform_0(%arg0: i32, %arg1: i32) -> (i32, i32) {
    %c0_i32 = arith.constant 0 : i32
    %c0_i32_0 = arith.constant 0 : i32
    return %arg0, %c0_i32 : i32, i32
  }
  func.func @transform_1(%arg0: i32, %arg1: i32) -> (i32, i32) {
    %c0_i32 = arith.constant 0 : i32
    %c0_i32_0 = arith.constant 0 : i32
    return %arg0, %c0_i32 : i32, i32
  }
  func.func @transform_2(%arg0: i32, %arg1: i32) -> (i32, i32) {
    %c0_i32 = arith.constant 0 : i32
    return %arg0, %arg1 : i32, i32
  }
  func.func @transform_3(%arg0: i32, %arg1: i32) -> (i32, i32) {
    %c0_i32 = arith.constant 0 : i32
    return %arg0, %arg1 : i32, i32
  }
}

</mosaic_0001>

<bundles_post_ra>
// kernel: tpu_custom_call.1
= control target key start
LH: loop header
LB: loop body
LE: loop exit
PB: predicated region body
PF: predicated region fallthrough
CT: control target
= control target key end

     0   :  { %s122_s0 = inlined_call_operand.vmem [shape: f32[8,1], index: 0, kind: input, shape index: {}]   ;;  %s123_s1 = inlined_call_operand.vmem [shape: f32[8,1], index: 1, kind: input, shape index: {}]   ;;  %s124_s2 = inlined_call_operand.vmem [shape: f32[8,256], index: 2, kind: input, shape index: {}]   ;;  %s125_s3 = inlined_call_operand.hbm [shape: f32[8,256], index: 3, kind: output, shape index: {}]  }
   0x1   :  { %v17_v0 = vld [vmem:[%s122_s0] sm:$0xff] }
   0x2   :  { %8 = vsyncpa [#allocation3], 0  ;;  %v76_v1 = vmov 0   ;;  %v25_v2 = vld [vmem:[%s123_s1] sm:$0xff]  ;;  %v16_v5 = vld [vmem:[%s124_s2 + $0x8] sm:$0xff]  ;;  %s77_s20 = smov [#allocation2]  }
   0x3   :  { %51 = vset.pattern.permute.xlu0 %v76_v1  ;;  %v15_v4 = vld [vmem:[%s124_s2] sm:$0xff]  ;;  %s41_s0 = sshll.u32 %s77_s20, 4  ;;  %s42_s0 = int_to_ptr.vmem [resolvable:$true] %s41_s0 }
   0x4   :  { %20 = vperm.xlu0 %51, %v17_v0   ;;  %s52_s1 = scalar_lea.vmem %s42_s0, 256  ;;  %p57_p1 = scmp.lt.s32.totalorder %s42_s0, %s42_s0 }
   0x5   :  { %p53_p0 = scmp.ne.s32.totalorder %s42_s0, %s52_s1  ;;  %p58_p2 = scmp.lt.s32.totalorder %s52_s1, %s52_s1 }
   0x7   :  { %p59_p3 = por %p58_p2, %p57_p1 }
   0x8   :  { %28 = vperm.xlu0 %51, %v25_v2  }
   0x9   :  { %p60_p4 = pnand %p59_p3, %p53_p0 }
  0x83   :  { %v21_v3 = vpop.permute.xlu0 %20 }
  0x84   :  { %v23_v6 = vmul.f32 %v21_v3, %v15_v4  ;;  %v24_v7 = vmul.f32 %v21_v3, %v16_v5 }
  0x87   :  { %v29_v8 = vpop.permute.xlu0 %28 }
  0x88   :  { %v31_v9 = vadd.f32 %v29_v8, %v23_v6  ;;  %v32_v10 = vadd.f32 %v29_v8, %v24_v7 }
  0x8a   :  { %33 = vst [vmem:[#allocation2] sm:$0xff] %v31_v9  ;;  %34 = vst [vmem:[#allocation2 + $0x8] sm:$0xff] %v32_v10 }
  0x8b   :  { %63 = shalt.err (!%p60_p4)
}
  0x8c   :  { %s64_s2 = scalar_lea.hbm %s125_s3, 256 }
  0x8d   :  { %p65_p5 = scmp.ne.s32.totalorder %s125_s3, %s64_s2  ;;  %p68_p6 = scmp.lt.u32.totalorder %s64_s2, %s125_s3 }
  0x8f   :  { %p70_p7 = pnand %p68_p6, %p65_p5 }
  0x91   :  { %73 = shalt.err (!%p70_p7)
}
  0x92   :  { %44 = dma.vmem_to_hbm [thread:$0]  %s42_s0, 256, %s125_s3, [#allocation3]  }
  0x93   :  { %74 = dma.done.wait [#allocation3], 256  }
  0x94   :  { %75 = vsyncadd [#allocation3], 4294967040 }
  0x95   :  { %48 = vsyncpa [#allocation3], 1 }

</bundles_post_ra>
